<compile_context>
chip_gen: v7x
topology: tpu7x:2x2x1
jax: 0.10.0
libtpu: 0.0.40
codegen_flags: <defaults>
</compile_context>

<pallas_src>
import math

import jax
import jax.numpy as jnp
from jax.experimental import pallas as pl
from jax.experimental.pallas import tpu as pltpu


_BLOCK_BUDGET_BYTES = 4 << 20   # per-block VMEM budget (x block == out block)
_VMEM_LIMIT_BYTES = 32 << 20    # covers double-buffered x + out (+ pe) with headroom


def make_positional_encoding_table(d_model, max_len=5000, dtype=jnp.float32):
    """Equivalent of the PyTorch register_buffer 'pe': shape (max_len, 1, d_model)."""
    position = jnp.arange(max_len, dtype=jnp.float32)[:, None]
    div_term = jnp.exp(
        jnp.arange(0, d_model, 2, dtype=jnp.float32) * (-math.log(10000.0) / d_model)
    )
    pe = jnp.zeros((max_len, d_model), dtype=jnp.float32)
    pe = pe.at[:, 0::2].set(jnp.sin(position * div_term))
    pe = pe.at[:, 1::2].set(jnp.cos(position * div_term))
    return pe[:, None, :].astype(dtype)  # (max_len, 1, d_model)


def _random_bits_u32(idx_u32, seed_u32):
    """Counter-based PRNG: lowbias32-style mix of (global element index, seed).

    Pure uint32 elementwise ops (mul/xor/shift) -> lowers on Mosaic TPU and in
    interpret mode, unlike the hardware PRNG primitives.
    """
    h = idx_u32 ^ (seed_u32 * jnp.uint32(0x9E3779B9))
    h = (h ^ (h >> 16)) * jnp.uint32(0x7FEB352D)
    h = (h ^ (h >> 15)) * jnp.uint32(0x846CA68B)
    return h ^ (h >> 16)


def _dropout_threshold(p):
    # Drop an element iff its 32 random bits are < p * 2^32.
    return min(int(round(p * 4294967296.0)), 4294967295)


def _make_flat_kernel(B, D, train, p):
    """Main path: x viewed as (S, B*D); pe rows (ts, D) tiled across batch in-kernel."""
    BD = B * D
    keep_scale = 1.0 / (1.0 - p) if p < 1.0 else 0.0
    threshold = _dropout_threshold(p)

    def kernel(seed_ref, x_ref, pe_ref, o_ref):
        ts = x_ref.shape[0]
        pe_tiled = jnp.tile(pe_ref[...], (1, B))             # (ts, B*D), matches b*D+d layout
        y = x_ref[...] + pe_tiled                             # compute in x.dtype
        if train and p > 0.0:
            seed = seed_ref[0].astype(jnp.uint32)
            row = jax.lax.broadcasted_iota(jnp.int32, (ts, BD), 0) + pl.program_id(0) * ts
            col = jax.lax.broadcasted_iota(jnp.int32, (ts, BD), 1)
            gidx = row.astype(jnp.uint32) * jnp.uint32(BD) + col.astype(jnp.uint32)
            keep = _random_bits_u32(gidx, seed) >= jnp.uint32(threshold)
            y = jnp.where(keep, y * keep_scale, jnp.zeros_like(y))
        o_ref[...] = y.astype(o_ref.dtype)

    return kernel


def _make_batched_kernel(B, D, train, p):
    """Fallback path: x kept as (S, B, D), batch tiled; pe block is (ts, 1, D)."""
    BD = B * D
    keep_scale = 1.0 / (1.0 - p) if p < 1.0 else 0.0
    threshold = _dropout_threshold(p)

    def kernel(seed_ref, x_ref, pe_ref, o_ref):
        ts, bb, _ = x_ref.shape
        y = x_ref[...] + pe_ref[...]                          # (ts,bb,D) + (ts,1,D)
        if train and p > 0.0:
            seed = seed_ref[0].astype(jnp.uint32)
            shp = (ts, bb, D)
            s_i = jax.lax.broadcasted_iota(jnp.int32, shp, 0) + pl.program_id(0) * ts
            b_i = jax.lax.broadcasted_iota(jnp.int32, shp, 1) + pl.program_id(1) * bb
            d_i = jax.lax.broadcasted_iota(jnp.int32, shp, 2)
            gidx = (s_i.astype(jnp.uint32) * jnp.uint32(BD)
                    + b_i.astype(jnp.uint32) * jnp.uint32(D)
                    + d_i.astype(jnp.uint32))
            keep = _random_bits_u32(gidx, seed) >= jnp.uint32(threshold)
            y = jnp.where(keep, y * keep_scale, jnp.zeros_like(y))
        o_ref[...] = y.astype(o_ref.dtype)

    return kernel


def positional_encoding_forward(x, pe, *, dropout_p=0.1, train=False, seed=0):
    """Forward of PositionalEncoding: dropout(x + pe[:x.shape[0]]).

    x:  (seq_len, batch, d_model)
    pe: (max_len, 1, d_model) precomputed table (register_buffer equivalent)
    seed: runtime scalar (int or traced) — no recompilation when it changes.
    """
    S, B, D = x.shape
    pe2 = pe.reshape(pe.shape[0], pe.shape[-1])               # (max_len, D)
    assert pe2.shape[1] == D and pe2.shape[0] >= S
    if pe2.dtype != x.dtype:
        pe2 = pe2.astype(x.dtype)                             # table values in [-1, 1]; bf16 is fine

    seed_arr = jnp.asarray(seed, dtype=jnp.int32).reshape(1)  # runtime SMEM scalar
    itemsize = x.dtype.itemsize
    BD = B * D
    row_bytes = BD * itemsize
    train = bool(train)
    p = float(dropout_p)

    if 8 * row_bytes <= _BLOCK_BUDGET_BYTES or S * row_bytes <= _BLOCK_BUDGET_BYTES:
        # ---- main path: fold (B, D) into the lane axis -> lane-dense blocks,
        # unmasked stores even for small B / D.
        max_rows = max(1, _BLOCK_BUDGET_BYTES // row_bytes)
        # Cap the block so there are >= ~4 grid steps when S allows (v7x: 2 TCs
        # x double-buffering), while keeping the second-minor block dim a
        # multiple of 8 (or the full extent S).
        ts = min(S, max_rows, max(8, pl.cdiv(S, 4)))
        if ts < S:
            ts = (ts // 8) * 8
        grid = (pl.cdiv(S, ts),)

        out = pl.pallas_call(
            _make_flat_kernel(B, D, train, p),
            out_shape=jax.ShapeDtypeStruct((S, BD), x.dtype),
            grid_spec=pl.GridSpec(
                grid=grid,
                in_specs=[
                    pl.BlockSpec(memory_space=pltpu.MemorySpace.SMEM),   # seed scalar
                    pl.BlockSpec((ts, BD), lambda i: (i, 0)),            # x rows (flattened)
                    pl.BlockSpec((ts, D), lambda i: (i, 0)),             # pe rows
                ],
                out_specs=pl.BlockSpec((ts, BD), lambda i: (i, 0)),
            ),
            compiler_params=pltpu.CompilerParams(
                dimension_semantics=("parallel",),
                vmem_limit_bytes=_VMEM_LIMIT_BYTES,
            ),
        )(seed_arr, x.reshape(S, BD), pe2)
        return out.reshape(S, B, D)

    # ---- fallback: one flattened row exceeds the block budget -> keep the
    # (S, B, D) layout and tile the batch dim too (D stays full-extent).
    ts = 8 if S >= 8 else S
    bb = max(1, _BLOCK_BUDGET_BYTES // max(1, ts * D * itemsize))
    if bb >= B:
        bb = B
    else:
        bb = min(B, max(8, (bb // 8) * 8))
    grid = (pl.cdiv(S, ts), pl.cdiv(B, bb))
    pe3 = pe2.reshape(pe2.shape[0], 1, D)

    out = pl.pallas_call(
        _make_batched_kernel(B, D, train, p),
        out_shape=jax.ShapeDtypeStruct((S, B, D), x.dtype),
        grid_spec=pl.GridSpec(
            grid=grid,
            in_specs=[
                pl.BlockSpec(memory_space=pltpu.MemorySpace.SMEM),       # seed scalar
                pl.BlockSpec((ts, bb, D), lambda i, j: (i, j, 0)),       # x block
                pl.BlockSpec((ts, 1, D), lambda i, j: (i, 0, 0)),        # pe rows
            ],
            out_specs=pl.BlockSpec((ts, bb, D), lambda i, j: (i, j, 0)),
        ),
        compiler_params=pltpu.CompilerParams(
            dimension_semantics=("parallel", "parallel"),
            vmem_limit_bytes=_VMEM_LIMIT_BYTES,
        ),
    )(seed_arr, x, pe3)
    return out


if __name__ == "__main__":
    key = jax.random.PRNGKey(0)
    # Shapes implied by the module's forward: x is (seq_len, batch, d_model).
    S, B, D = 8, 4, 32
    x = jax.random.normal(key, (S, B, D), dtype=jnp.float32)
    pe = make_positional_encoding_table(D, max_len=5000, dtype=jnp.float32)

    # --- eval mode (dropout is identity, like module.eval()) ---
    y = positional_encoding_forward(x, pe, dropout_p=0.1, train=False)
    y = jax.block_until_ready(y)
    ref = x + pe[:S]  # broadcast over batch
    assert y.shape == x.shape and y.dtype == x.dtype
    assert bool(jnp.allclose(y, ref, atol=1e-5, rtol=1e-5))

    # --- train mode (dropout active, p=0.1): each element is either exactly
    # dropped to 0 or scaled by 1/(1-p) ---
    p = 0.1
    yt = positional_encoding_forward(x, pe, dropout_p=p, train=True, seed=1234)
    yt = jax.block_until_ready(yt)
    scaled = ref / (1.0 - p)
    elem_ok = jnp.minimum(jnp.abs(yt), jnp.abs(yt - scaled)) <= 1e-4 * (1.0 + jnp.abs(scaled))
    assert bool(jnp.all(elem_ok))
    frac_dropped = float(jnp.mean((yt == 0.0).astype(jnp.float32)))
    assert 0.0 < frac_dropped < 0.5

    # Same seed -> identical mask (seed is a runtime input, no recompile needed).
    yt2 = jax.block_until_ready(
        positional_encoding_forward(x, pe, dropout_p=p, train=True, seed=1234))
    assert bool(jnp.array_equal(yt, yt2))

    print("KERNEL_OK")
</pallas_src>

<mosaic_0001>
module attributes {stable_mosaic.version = 11 : i64} {
  func.func @kernel(%arg0: i32, %arg1: memref<1xi32, #tpu.memory_space<smem>>, %arg2: memref<8x128xf32, #tpu.memory_space<vmem>>, %arg3: memref<8x32xf32, #tpu.memory_space<vmem>>, %arg4: memref<8x128xf32, #tpu.memory_space<vmem>>) attributes {dimension_semantics = [#tpu.dimension_semantics<parallel>], iteration_bounds = array<i64: 1>, scalar_prefetch = 0 : i64, scratch_operands = 0 : i64, tpu.core_type = #tpu.core_type<tc>, window_params = [{transform_indices = @transform_0, window_bounds = array<i64: 1>}, {transform_indices = @transform_1, window_bounds = array<i64: 8, 128>}, {transform_indices = @transform_2, window_bounds = array<i64: 8, 32>}, {transform_indices = @transform_3, window_bounds = array<i64: 8, 128>}]} {
    %c0 = arith.constant 0 : index
    %c0_0 = arith.constant 0 : index
    %0 = vector.load %arg3[%c0, %c0_0] : memref<8x32xf32, #tpu.memory_space<vmem>>, vector<8x32xf32>
    %1 = tpu.concatenate %0, %0, %0, %0 in 1 : vector<8x32xf32>, vector<8x32xf32>, vector<8x32xf32>, vector<8x32xf32> -> vector<8x128xf32>
    %c0_1 = arith.constant 0 : index
    %c0_2 = arith.constant 0 : index
    %2 = vector.load %arg2[%c0_1, %c0_2] : memref<8x128xf32, #tpu.memory_space<vmem>>, vector<8x128xf32>
    %3 = arith.addf %2, %1 : vector<8x128xf32>
    %c0_3 = arith.constant 0 : index
    %c0_4 = arith.constant 0 : index
    %4 = vector.load %arg4[%c0_3, %c0_4] : memref<8x128xf32, #tpu.memory_space<vmem>>, vector<8x128xf32>
    tpu.vector_store %arg4[%c0_3, %c0_4], %3 {strides = array<i32>} : memref<8x128xf32, #tpu.memory_space<vmem>>, vector<8x128xf32>,
    return
  }
  func.func @transform_0(%arg0: i32) -> i32 {
    %c0_i32 = arith.constant 0 : i32
    %c0_i32_0 = arith.constant 0 : i32
    return %c0_i32 : i32
  }
  func.func @transform_1(%arg0: i32) -> (i32, i32) {
    %c0_i32 = arith.constant 0 : i32
    %c0_i32_0 = arith.constant 0 : i32
    return %arg0, %c0_i32 : i32, i32
  }
  func.func @transform_2(%arg0: i32) -> (i32, i32) {
    %c0_i32 = arith.constant 0 : i32
    %c0_i32_0 = arith.constant 0 : i32
    return %arg0, %c0_i32 : i32, i32
  }
  func.func @transform_3(%arg0: i32) -> (i32, i32) {
    %c0_i32 = arith.constant 0 : i32
    %c0_i32_0 = arith.constant 0 : i32
    return %arg0, %c0_i32 : i32, i32
  }
}

</mosaic_0001>

<bundles_post_ra>
// kernel: tpu_custom_call.1
= control target key start
LH: loop header
LB: loop body
LE: loop exit
PB: predicated region body
PF: predicated region fallthrough
CT: control target
= control target key end

     0   :  { %s78_s14 = smov 32   ;;  %s120_s0 = inlined_call_operand.<no memory space> [shape: s32[1], index: 0, kind: input, shape index: {}]   ;;  %s121_s1 = inlined_call_operand.vmem [shape: f32[8,128], index: 1, kind: input, shape index: {}]   ;;  %s122_s2 = inlined_call_operand.vmem [shape: f32[5000,32], index: 2, kind: input, shape index: {}]   ;;  %s123_s3 = inlined_call_operand.hbm [shape: f32[8,128], index: 3, kind: output, shape index: {}]  }
   0x1   :  { %v16_v0 = vld [vmem:[%s122_s2] sm:$0xff] }
   0x2   :  { %18 = vrot.lane.b32.xlu0 %v16_v0, %s78_s14 }
   0x3   :  { %9 = vsyncpa [#allocation4], 0  ;;  %s79_s15 = smov 96   ;;  %s80_s16 = smov 64   ;;  %vm27_vm0 = vcmask 261120   ;;  %vm29_vm1 = vcmask 523264  }
   0x4   :  { %24 = vrot.lane.b32.xlu1 %v16_v0, %s79_s15  ;;  %vm31_vm2 = vcmask 785408   ;;  %v33_v5 = vld [vmem:[%s121_s1] sm:$0xff]  ;;  %s81_s18 = smov [#allocation3]  }
   0x5   :  { %s42_s2 = sshll.u32 %s81_s18, 4  ;;  %s43_s2 = int_to_ptr.vmem [resolvable:$true] %s42_s2 }
   0x6   :  { %21 = vrot.lane.b32.xlu0 %v16_v0, %s80_s16  ;;  %s54_s19 = scalar_lea.vmem %s43_s2, 128  ;;  %p59_p1 = scmp.lt.s32.totalorder %s43_s2, %s43_s2 }
   0x7   :  { %p55_p0 = scmp.ne.s32.totalorder %s43_s2, %s54_s19  ;;  %p60_p2 = scmp.lt.s32.totalorder %s54_s19, %s54_s19 }
   0x9   :  { %p61_p3 = por %p60_p2, %p59_p1 }
   0xb   :  { %p62_p4 = pnand %p61_p3, %p55_p0 }
  0x74   :  { %v19_v1 = vpop.permute.xlu0 %18 }
  0x75   :  { %v28_v3 = vsel %vm27_vm0, %v16_v0, %v19_v1 }
  0x76   :  { %v25_v2 = vpop.permute.xlu1 %24 }
  0x78   :  { %v22_v4 = vpop.permute.xlu0 %21 }
  0x79   :  { %v30_v6 = vsel %vm29_vm1, %v28_v3, %v22_v4 }
  0x7a   :  { %v32_v7 = vsel %vm31_vm2, %v30_v6, %v25_v2 }
  0x7b   :  { %v34_v8 = vadd.f32 %v33_v5, %v32_v7 }
  0x7d   :  { %35 = vst [vmem:[#allocation3] sm:$0xff] %v34_v8 }
  0x7e   :  { %65 = shalt.err (!%p62_p4)
}
  0x7f   :  { %s66_s22 = scalar_lea.hbm %s123_s3, 128 }
  0x80   :  { %p67_p5 = scmp.ne.s32.totalorder %s123_s3, %s66_s22  ;;  %p70_p6 = scmp.lt.u32.totalorder %s66_s22, %s123_s3 }
  0x82   :  { %p72_p7 = pnand %p70_p6, %p67_p5 }
  0x84   :  { %75 = shalt.err (!%p72_p7)
}
  0x85   :  { %45 = dma.vmem_to_hbm [thread:$0]  %s43_s2, 128, %s123_s3, [#allocation4]  }
  0x86   :  { %76 = dma.done.wait [#allocation4], 128  }
  0x87   :  { %77 = vsyncadd [#allocation4], 4294967168 }
  0x88   :  { %49 = vsyncpa [#allocation4], 1 }

</bundles_post_ra>
